<compile_context>
chip_gen: v7x
topology: tpu7x:2x2x1
jax: 0.10.0
libtpu: 0.0.40
codegen_flags: <defaults>
</compile_context>

<pallas_src>
import jax
import jax.numpy as jnp
from jax.experimental import pallas as pl
from jax.experimental.pallas import tpu as pltpu

_LANES = 128      # vreg lane width (last dim)
_SUBLANES = 8     # vreg sublane count (second-to-last dim, f32)
_MAX_TB = 512     # batch tile: multiple of 256 (v6e/v7x MXU tile), ~1.6MB/step


def _round_up(n, m):
    return ((n + m - 1) // m) * m


def _linear_kernel(x_ref, w_ref, b_ref, o_ref):
    # bf16 cast of x happens here (VPU), feeding one MXU matmul with f32
    # accumulation; bias add stays f32.  Lane-dense (TB, 128) store.
    x_bf16 = x_ref[...].astype(jnp.bfloat16)
    acc = jnp.dot(x_bf16, w_ref[...], preferred_element_type=jnp.float32)
    o_ref[...] = acc + b_ref[...]


def prepare_params(weight, bias):
    """One-time parameter prep (done outside the hot forward path).

    Folds the transpose, the lane padding to a multiple of 128 and the bf16
    cast of the fc1 weight into parameter load, so the forward never
    materializes a second copy of W.

    Args:
      weight: (num_classes, in_features) float32  -- PyTorch nn.Linear layout
      bias:   (num_classes,)             float32
    Returns:
      w_prepped: (in_features, n_pad) bfloat16
      b_prepped: (1, n_pad)           float32
    """
    num_classes, in_features = weight.shape
    n_pad = _round_up(num_classes, _LANES)

    w_prepped = jnp.zeros((in_features, n_pad), jnp.bfloat16)
    w_prepped = w_prepped.at[:, :num_classes].set(weight.T.astype(jnp.bfloat16))

    b_prepped = jnp.zeros((1, n_pad), jnp.float32)
    b_prepped = b_prepped.at[:, :num_classes].set(bias.astype(jnp.float32))
    return w_prepped, b_prepped


def make_simple_forward(weight, bias):
    """Builds a jitted forward(x) equivalent to Simple.forward.

    Note: operands are bf16 on the MXU (f32 accumulation + f32 bias), which
    differs slightly from PyTorch's f32 Linear.  If bit-level parity is
    needed, keep W in f32 in prepare_params and drop the in-kernel cast --
    this kernel is nowhere near compute-bound either way.
    """
    num_classes, in_features = weight.shape
    w_prepped, b_prepped = prepare_params(weight, bias)
    n_pad = w_prepped.shape[1]

    @jax.jit
    def forward(x):
        b = x.shape[0]
        # Flatten == torch x.view(B, -1); contiguous NCHW -> free layout-wise.
        x_flat = x.reshape(b, in_features)

        # Batch tile: full (sublane-rounded) batch as a single block while it
        # is small; 512-row blocks (multiple of 256) once it grows, so the two
        # v7x TensorCores split the grid and x DMAs double-buffer.
        tb = min(_MAX_TB, _round_up(b, _SUBLANES))
        grid = (pl.cdiv(b, tb),)

        out_p = pl.pallas_call(
            _linear_kernel,
            out_shape=jax.ShapeDtypeStruct((b, n_pad), jnp.float32),
            grid=grid,
            in_specs=[
                # x: tiled along batch, full K (784) in the lane-minor dim.
                pl.BlockSpec((tb, in_features), lambda i: (i, 0)),
                # W / bias: constant index_map -> VMEM-resident across steps.
                pl.BlockSpec((in_features, n_pad), lambda i: (0, 0)),
                pl.BlockSpec((1, n_pad), lambda i: (0, 0)),
            ],
            out_specs=pl.BlockSpec((tb, n_pad), lambda i: (i, 0)),
            compiler_params=pltpu.CompilerParams(
                dimension_semantics=("parallel",)),
        )(x_flat, w_prepped, b_prepped)

        # Final lane slice keeps the module's (B, num_classes) contract.
        # TODO(synk): consumers that tolerate lane padding (loss/argmax) can
        # take out_p directly and skip this small XLA copy.
        return out_p[:, :num_classes]

    return forward


if __name__ == "__main__":
    # Module defaults: input_channels=1, image_size=28, num_classes=10.
    input_channels, image_size, num_classes = 1, 28, 10
    in_features = input_channels * image_size * image_size
    batch = 2

    key = jax.random.PRNGKey(0)
    kx, kw, kb = jax.random.split(key, 3)

    # Deterministic parameter init (Kaiming-uniform-like bound, as nn.Linear).
    bound = 1.0 / jnp.sqrt(jnp.float32(in_features))
    weight = jax.random.uniform(
        kw, (num_classes, in_features), jnp.float32, -bound, bound)
    bias = jax.random.uniform(
        kb, (num_classes,), jnp.float32, -bound, bound)

    x = jax.random.normal(
        kx, (batch, input_channels, image_size, image_size), jnp.float32)

    forward = make_simple_forward(weight, bias)
    out = jax.block_until_ready(forward(x))

    # Sanity check against plain-JAX f32 reference.
    # Tolerance loosened for bf16 operands (f32 accumulation, K=784).
    ref = x.reshape(batch, -1) @ weight.T + bias
    assert out.shape == (batch, num_classes)
    assert jnp.allclose(out, ref, atol=2e-2, rtol=2e-2), float(
        jnp.max(jnp.abs(out - ref)))

    print("KERNEL_OK")
</pallas_src>

<mosaic_0001>
module attributes {stable_mosaic.version = 11 : i64} {
  func.func @_linear_kernel(%arg0: i32, %arg1: memref<8x784xf32, #tpu.memory_space<vmem>>, %arg2: memref<784x128xbf16, #tpu.memory_space<vmem>>, %arg3: memref<1x128xf32, #tpu.memory_space<vmem>>, %arg4: memref<8x128xf32, #tpu.memory_space<vmem>>) attributes {dimension_semantics = [#tpu.dimension_semantics<parallel>], iteration_bounds = array<i64: 1>, scalar_prefetch = 0 : i64, scratch_operands = 0 : i64, tpu.core_type = #tpu.core_type<tc>, window_params = [{transform_indices = @transform_0, window_bounds = array<i64: 8, 784>}, {pipeline_mode = #tpu.pipeline_mode<synchronous>, transform_indices = @transform_1, window_bounds = array<i64: 784, 128>}, {pipeline_mode = #tpu.pipeline_mode<synchronous>, transform_indices = @transform_2, window_bounds = array<i64: 1, 128>}, {transform_indices = @transform_3, window_bounds = array<i64: 8, 128>}]} {
    %c0 = arith.constant 0 : index
    %c0_0 = arith.constant 0 : index
    %0 = vector.load %arg1[%c0, %c0_0] : memref<8x784xf32, #tpu.memory_space<vmem>>, vector<8x784xf32>
    %1 = arith.truncf %0 : vector<8x784xf32> to vector<8x784xbf16>
    %c0_1 = arith.constant 0 : index
    %c0_2 = arith.constant 0 : index
    %2 = vector.load %arg2[%c0_1, %c0_2] : memref<784x128xbf16, #tpu.memory_space<vmem>>, vector<784x128xbf16>
    %cst = arith.constant dense<0.000000e+00> : vector<8x128xf32>
    %3 = tpu.matmul %1, %2, %cst {dimension_numbers = #tpu.dot_dimension_numbers<[1], [0], [0], [1], [0, 0, 1, 1], [], []>} : vector<8x784xbf16>, vector<784x128xbf16>, vector<8x128xf32> -> vector<8x128xf32>
    %c0_3 = arith.constant 0 : index
    %c0_4 = arith.constant 0 : index
    %4 = vector.load %arg3[%c0_3, %c0_4] : memref<1x128xf32, #tpu.memory_space<vmem>>, vector<1x128xf32>
    %5 = vector.broadcast %4 : vector<1x128xf32> to vector<8x128xf32>
    %6 = arith.addf %3, %5 : vector<8x128xf32>
    %c0_5 = arith.constant 0 : index
    %c0_6 = arith.constant 0 : index
    %7 = vector.load %arg4[%c0_5, %c0_6] : memref<8x128xf32, #tpu.memory_space<vmem>>, vector<8x128xf32>
    tpu.vector_store %arg4[%c0_5, %c0_6], %6 {strides = array<i32>} : memref<8x128xf32, #tpu.memory_space<vmem>>, vector<8x128xf32>,
    return
  }
  func.func @transform_0(%arg0: i32) -> (i32, i32) {
    %c0_i32 = arith.constant 0 : i32
    %c0_i32_0 = arith.constant 0 : i32
    return %arg0, %c0_i32 : i32, i32
  }
  func.func @transform_1(%arg0: i32) -> (i32, i32) {
    %c0_i32 = arith.constant 0 : i32
    %c0_i32_0 = arith.constant 0 : i32
    %c0_i32_1 = arith.constant 0 : i32
    return %c0_i32, %c0_i32_0 : i32, i32
  }
  func.func @transform_2(%arg0: i32) -> (i32, i32) {
    %c0_i32 = arith.constant 0 : i32
    %c0_i32_0 = arith.constant 0 : i32
    %c0_i32_1 = arith.constant 0 : i32
    return %c0_i32, %c0_i32_0 : i32, i32
  }
  func.func @transform_3(%arg0: i32) -> (i32, i32) {
    %c0_i32 = arith.constant 0 : i32
    %c0_i32_0 = arith.constant 0 : i32
    return %arg0, %c0_i32 : i32, i32
  }
}

</mosaic_0001>

<bundles_post_ra>
// kernel: forward.1
= control target key start
LH: loop header
LB: loop body
LE: loop exit
PB: predicated region body
PF: predicated region fallthrough
CT: control target
= control target key end

     0   :  { %8 = vsyncpa [#allocation3], 0  ;;  %s1045_s0 = inlined_call_operand.vmem [shape: f32[2,784], index: 0, kind: input, shape index: {}]   ;;  %s1046_s1 = inlined_call_operand.hbm [shape: bf16[784,128], index: 1, kind: input, shape index: {}]   ;;  %s1047_s2 = inlined_call_operand.vmem [shape: f32[1,128], index: 2, kind: input, shape index: {}]   ;;  %s1048_s3 = inlined_call_operand.hbm [shape: f32[2,128], index: 3, kind: output, shape index: {}]  }
   0x1   :  { %9 = vsyncpa [#allocation4], 0  ;;  %s955_s12 = smov [#allocation2]   ;;  %s907_s16 = scalar_lea.hbm %s1046_s1, 6272 }
   0x2   :  { %s17_s13 = sshll.u32 %s955_s12, 4  ;;  %p908_p0 = scmp.ne.s32.totalorder %s1046_s1, %s907_s16  ;;  %s18_s13 = int_to_ptr.vmem [resolvable:$true] %s17_s13 }
   0x3   :  { %p911_p1 = scmp.lt.u32.totalorder %s907_s16, %s1046_s1 }
   0x5   :  { %p913_p2 = pnand %p911_p1, %p908_p0 }
   0x7   :  { %916 = shalt.err (!%p913_p2)
}
   0x8   :  { %s917_s21 = scalar_lea.vmem %s18_s13, 6272  ;;  %p922_p4 = scmp.lt.s32.totalorder %s18_s13, %s18_s13 }
   0x9   :  { %p918_p3 = scmp.ne.s32.totalorder %s18_s13, %s917_s21  ;;  %p923_p5 = scmp.lt.s32.totalorder %s917_s21, %s917_s21 }
   0xb   :  { %p924_p6 = por %p923_p5, %p922_p4 }
   0xd   :  { %p925_p7 = pnand %p924_p6, %p918_p3 }
   0xf   :  { %928 = shalt.err (!%p925_p7)
}
  0x10   :  { %s956_s22 = smov 64   ;;  %s957_s23 = smov 4  }
  0x11   :  { %23 = dma.hbm_to_vmem [thread:$0]  %s1046_s1, 6272, %s18_s13, [#allocation3], %s956_s22, %s956_s22, %s957_s23  }
  0x12   :  { %951 = dma.done.wait [#allocation3], 6272  }
  0x13   :  { %952 = vsyncadd [#allocation3], 4294961024  ;;  %v846_v0 = vld [vmem:[#allocation2 + $0x40] sm:$0xff]   ;;  %v850_v4 = vld [vmem:[#allocation2 + $0x48] sm:$0xff]   ;;  %v958_v23 = vmov 1983009808   ;;  %v53_v25 = vlaneseq }
  0x14   :  { %v847_v1 = vld [vmem:[#allocation2] sm:$0xff]   ;;  %763 = vmatprep.subr.bf16.mxu0 %v846_v0  ;;  %v851_v5 = vld [vmem:[#allocation2 + $0x8] sm:$0xff]   ;;  %v854_v8 = vld [vmem:[#allocation2 + $0x50] sm:$0xff]   ;;  %v51_v24 = vunpack.c.l.s4 %v958_v23  ;;  %v959_v47 = vmov 0.0   ;;  %vm960_vm0 = vmmov 0   ;;  %vm530_vm1 = vcmask 130048  }
  0x15   :  { %v848_v2 = vld [vmem:[#allocation2 + $0xc0] sm:$0xff]   ;;  %764 = vmatpush3.bf16.msra.mxu0 %v847_v1  ;;  %v852_v6 = vld [vmem:[#allocation2 + $0xc8] sm:$0xff]   ;;  %v855_v9 = vld [vmem:[#allocation2 + $0x10] sm:$0xff]   ;;  %v54_v31 = vshrl.u32 %v53_v25, 7 }
  0x16   :  { %v849_v3 = vld [vmem:[#allocation2 + $0x80] sm:$0xff]   ;;  %785 = vmatprep.subr.bf16.mxu1 %v848_v2  ;;  %765 = vmatprep.subr.bf16.mxu0 %v850_v4  ;;  %v853_v7 = vld [vmem:[#allocation2 + $0x88] sm:$0xff]   ;;  %v856_v10 = vld [vmem:[#allocation2 + $0xd0] sm:$0xff]   ;;  %v52_v30 = vunpack.c.0.s8 %v51_v24 }
  0x17   :  { %786 = vmatpush3.bf16.msra.mxu1 %v849_v3  ;;  %v857_v11 = vld [vmem:[#allocation2 + $0x90] sm:$0xff]   ;;  %v858_v12 = vld [vmem:[#allocation2 + $0x58] sm:$0xff]   ;;  %v862_v16 = vld [vmem:[#allocation2 + $0x60] sm:$0xff]  }
  0x18   :  { %787 = vmatprep.subr.bf16.mxu1 %v852_v6  ;;  %v859_v13 = vld [vmem:[#allocation2 + $0x18] sm:$0xff]   ;;  %v863_v17 = vld [vmem:[#allocation2 + $0x20] sm:$0xff]   ;;  %v866_v20 = vld [vmem:[#allocation2 + $0x68] sm:$0xff]   ;;  %v996_v36 = vsub.s32 %v52_v30, %v54_v31 }
  0x19   :  { %766 = vmatpush3.bf16.msra.mxu0 %v851_v5  ;;  %v860_v14 = vld [vmem:[#allocation2 + $0xd8] sm:$0xff]   ;;  %v864_v18 = vld [vmem:[#allocation2 + $0xe0] sm:$0xff]   ;;  %v867_v21 = vld [vmem:[#allocation2 + $0x28] sm:$0xff]  }
  0x1a   :  { %767 = vmatprep.subr.bf16.mxu0 %v854_v8  ;;  %v861_v15 = vld [vmem:[#allocation2 + $0x98] sm:$0xff]   ;;  %v865_v19 = vld [vmem:[#allocation2 + $0xa0] sm:$0xff]   ;;  %v868_v22 = vld [vmem:[#allocation2 + $0xe8] sm:$0xff]  }
  0x1b   :  { %788 = vmatpush3.bf16.msra.mxu1 %v853_v7  ;;  %v869_v26 = vld [vmem:[#allocation2 + $0xa8] sm:$0xff]   ;;  %v870_v27 = vld [vmem:[#allocation2 + $0x70] sm:$0xff]   ;;  %v874_v33 = vld [vmem:[#allocation2 + $0x78] sm:$0xff]  }
  0x1c   :  { %789 = vmatprep.subr.bf16.mxu1 %v856_v10  ;;  %v871_v28 = vld [vmem:[#allocation2 + $0x30] sm:$0xff]   ;;  %v875_v34 = vld [vmem:[#allocation2 + $0x38] sm:$0xff]   ;;  %v882_v42 = vld [vmem:[#allocation2 + $0x140] sm:$0xff]  }
  0x1d   :  { %768 = vmatpush3.bf16.msra.mxu0 %v855_v9  ;;  %v872_v29 = vld [vmem:[#allocation2 + $0xf0] sm:$0xff]   ;;  %v876_v35 = vld [vmem:[#allocation2 + $0xf8] sm:$0xff]   ;;  %v885_v52 = vld [vmem:[#allocation2 + $0x100] sm:$0xff]  }
  0x1e   :  { %769 = vmatprep.subr.bf16.mxu0 %v858_v12  ;;  %v873_v32 = vld [vmem:[#allocation2 + $0xb0] sm:$0xff]   ;;  %v879_v38 = vld [vmem:[%s1045_s0 + $0x1c] ss:$14 sps:$4 sm:$0xff]   ;;  %v892_v63 = vld [vmem:[#allocation2 + $0x160] sm:$0xff]  }
  0x1f   :  { %790 = vmatpush3.bf16.msra.mxu1 %v857_v11  ;;  %v877_v37 = vld [vmem:[%s1045_s0] ss:$14 sps:$4 sm:$0xff]   ;;  %v881_v39 = vld [vmem:[#allocation2 + $0xb8] sm:$0xff]   ;;  %v70_v41 = vrot.slane %v879_v38, %v996_v36  ;;  %v883_v43 = vld [vmem:[%s1045_s0 + $0x4] ss:$14 sps:$4 sm:$0xff]  }
  0x20   :  { %791 = vmatprep.subr.bf16.mxu1 %v860_v14  ;;  %v56_v40 = vrot.slane %v877_v37, %v996_v36  ;;  %v884_v44 = vld [vmem:[%s1045_s0 + $0x20] ss:$14 sps:$4 sm:$0xff]   ;;  %v63_v48 = vrot.slane %v883_v43, %v996_v36  ;;  %v890_v61 = vld [vmem:[#allocation2 + $0x158] sm:$0xff]   ;;  %v904_v4 = vld [vmem:[%s1045_s0 + $0x24] ss:$14 sps:$4 sm:$0xff]  }
  0x21   :  { %770 = vmatpush3.bf16.msra.mxu0 %v859_v13  ;;  %v77_v49 = vrot.slane %v884_v44, %v996_v36  ;;  %v886_v55 = vld [vmem:[#allocation2 + $0x148] sm:$0xff]   ;;  %v888_v59 = vld [vmem:[#allocation2 + $0x150] sm:$0xff]   ;;  %v891_v62 = vld [vmem:[#allocation2 + $0x118] sm:$0xff]   ;;  %v106_v9 = vrot.slane %v904_v4, %v996_v36 }
  0x22   :  { %771 = vmatprep.subr.bf16.mxu0 %v862_v16  ;;  %v79_v45 = vcombine.high %v56_v40, %v70_v41  ;;  %v78_v46 = vcombine.low %v56_v40, %v70_v41  ;;  %v887_v58 = vld [vmem:[#allocation2 + $0x108] sm:$0xff]   ;;  %v889_v60 = vld [vmem:[#allocation2 + $0x110] sm:$0xff]   ;;  %v900_v0 = vld [vmem:[#allocation2 + $0x180] sm:$0xff]  }
  0x23   :  { %792 = vmatpush3.bf16.msra.mxu1 %v861_v15  ;;  %v81_v53 = vcombine.high %v63_v48, %v77_v49  ;;  %v80_v54 = vcombine.low %v63_v48, %v77_v49  ;;  %v901_v1 = vld [vmem:[%s1045_s0 + $0x8] ss:$14 sps:$4 sm:$0xff]   ;;  %v903_v2 = vld [vmem:[%s1045_s0 + $0xc] ss:$14 sps:$4 sm:$0x33]   ;;  %v893_v3 = vld [vmem:[#allocation2 + $0x120] sm:$0xff]  }
  0x24   :  { %793 = vmatprep.subr.bf16.mxu1 %v864_v18  ;;  %v125_v50 = vpack.c.bf16 %v79_v45, %v79_v45  ;;  %v124_v51 = vpack.c.bf16 %v78_v46, %v78_v46  ;;  %v906_v5 = vld [vmem:[%s1045_s0 + $0x28] ss:$14 sps:$4 sm:$0x33]   ;;  %v92_v7 = vrot.slane %v901_v1, %v996_v36  ;;  %v99_v8 = vrot.slane %v903_v2, %v996_v36  ;;  %v898_v18 = vld [vmem:[#allocation2 + $0x178] sm:$0xff]   ;;  %v712_v23 = vld [vmem:[%s1047_s2] ss:$0 sm:$0xff] }
  0x25   :  { %772 = vmatpush3.bf16.msra.mxu0 %v863_v17  ;;  %v127_v56 = vpack.c.bf16 %v81_v53, %v81_v53  ;;  %v126_v57 = vpack.c.bf16 %v80_v54, %v80_v54  ;;  %v894_v6 = vld [vmem:[#allocation2 + $0x168] sm:$0xff]   ;;  %v113_v10 = vrot.slane %v906_v5, %v996_v36  ;;  %v896_v14 = vld [vmem:[#allocation2 + $0x170] sm:$0xff]  }
  0x26   :  { %773 = vmatprep.subr.bf16.mxu0 %v866_v20  ;;  %566 = vmatprep.mubr.bf16.mxu0 %v125_v50  ;;  %v895_v11 = vld [vmem:[#allocation2 + $0x128] sm:$0xff]   ;;  %v115_v12 = vcombine.high %v92_v7, %v106_v9  ;;  %v897_v17 = vld [vmem:[#allocation2 + $0x130] sm:$0xff]   ;;  %v899_v20 = vld [vmem:[#allocation2 + $0x138] sm:$0xff]  }
  0x27   :  { %794 = vmatpush3.bf16.msra.mxu1 %v865_v19  ;;  %606 = vmatprep.mubr.bf16.mxu1 %v127_v56  ;;  %v116_v13 = vcombine.low %v99_v8, %v113_v10  ;;  %v114_v19 = vcombine.low %v92_v7, %v106_v9 }
  0x28   :  { %795 = vmatprep.subr.bf16.mxu1 %v868_v22  ;;  %v129_v15 = vpack.c.bf16 %v115_v12, %v115_v12 }
  0x29   :  { %774 = vmatpush3.bf16.msra.mxu0 %v867_v21  ;;  %v130_v16 = vpack.c.bf16 %v116_v13, %v116_v13  ;;  %v128_v21 = vpack.c.bf16 %v114_v19, %v114_v19 }
  0x2a   :  { %775 = vmatprep.subr.bf16.mxu0 %v870_v27 }
  0x2b   :  { %796 = vmatpush3.bf16.msra.mxu1 %v869_v26 }
  0x2c   :  { %797 = vmatprep.subr.bf16.mxu1 %v872_v29 }
  0x2d   :  { %776 = vmatpush3.bf16.msra.mxu0 %v871_v28 }
  0x2e   :  { %777 = vmatprep.subr.bf16.mxu0 %v874_v33 }
  0x2f   :  { %798 = vmatpush3.bf16.msra.mxu1 %v873_v32 }
  0x30   :  { %799 = vmatprep.subr.bf16.mxu1 %v876_v35 }
  0x31   :  { %778 = vmatpush3.bf16.msra.mxu0 %v875_v34 }
  0x32   :  { %807 = vmatprep.subr.bf16.mxu0 %v882_v42 }
  0x33   :  { %800 = vmatpush3.bf16.msra.mxu1 %v881_v39 }
  0x34   :  { %831 = vmatprep.subr.bf16.mxu1 %v959_v47  ;;  %567 = vmatmul.mubr.bf16.vlgmr.msra.gmra.mrb[0].mxu0 %v124_v51 }
  0x35   :  { %808 = vmatpush3.bf16.msra.mxu0 %v885_v52  ;;  %646 = vmatprep.mubr.bf16.mxu0 %v129_v15 }
  0x36   :  { %809 = vmatprep.subr.bf16.mxu0 %v886_v55  ;;  %607 = vmatmul.mubr.bf16.vlgmr.msra.gmra.mrb[0].mxu1 %v126_v57 }
  0x37   :  { %833 = vmatprep.mubr.msk.bf16.mxu1 %vm960_vm0, %v959_v47  ;;  %832 = vmatpush3.bf16.msra.mxu1 %v900_v0 }
  0x39   :  { %810 = vmatpush3.bf16.msra.mxu0 %v887_v58 }
  0x3a   :  { %811 = vmatprep.subr.bf16.mxu0 %v888_v59 }
  0x3d   :  { %812 = vmatpush3.bf16.msra.mxu0 %v889_v60 }
  0x3e   :  { %813 = vmatprep.subr.bf16.mxu0 %v890_v61  ;;  %834 = vmatmul.mubr.msk.bf16.vlgmr.msra.gmra.mrb[4].mxu1 %vm530_vm1, %v130_v16 }
  0x41   :  { %814 = vmatpush3.bf16.msra.mxu0 %v891_v62 }
  0x42   :  { %815 = vmatprep.subr.bf16.mxu0 %v892_v63 }
  0x45   :  { %816 = vmatpush3.bf16.msra.mxu0 %v893_v3 }
  0x46   :  { %817 = vmatprep.subr.bf16.mxu0 %v894_v6 }
  0x49   :  { %818 = vmatpush3.bf16.msra.mxu0 %v895_v11 }
  0x4a   :  { %819 = vmatprep.subr.bf16.mxu0 %v896_v14 }
  0x4d   :  { %820 = vmatpush3.bf16.msra.mxu0 %v897_v17 }
  0x4e   :  { %821 = vmatprep.subr.bf16.mxu0 %v898_v18 }
  0x51   :  { %822 = vmatpush3.bf16.msra.mxu0 %v899_v20 }
  0x54   :  { %647 = vmatmul.mubr.bf16.vlgmr.msra.gmra.mrb[4].mxu0 %v128_v21 }
 0x107   :  { %v779_v22 = vpop.f32.mrb[0].mxu0 }
 0x108   :  { %v780_v24 = vpop.f32.mrb[1].mxu0 }
 0x109   :  { %v781_v25 = vadd.f32 %v780_v24, %v779_v22  ;;  %v782_v26 = vpop.f32.mrb[2].mxu0  ;;  %v801_v27 = vpop.f32.mrb[0].mxu1 }
 0x10a   :  { %v783_v28 = vpop.f32.mrb[3].mxu0  ;;  %v802_v30 = vpop.f32.mrb[1].mxu1 }
 0x10b   :  { %v569_v29 = vadd.f32 %v781_v25, %v712_v23  ;;  %v803_v31 = vadd.f32 %v802_v30, %v801_v27  ;;  %v804_v32 = vpop.f32.mrb[2].mxu1 }
 0x10c   :  { %v805_v33 = vpop.f32.mrb[3].mxu1 }
 0x10d   :  { %v609_v34 = vadd.f32 %v803_v31, %v569_v29 }
 0x111   :  { %v688_v35 = vpop.f32.mrb[4].mxu1 }
 0x112   :  { %v835_v36 = vpop.f32.mrb[5].mxu1 }
 0x113   :  { %v691_v37 = vpop.f32.mrb[6].mxu1 }
 0x114   :  { %v836_v38 = vpop.f32.mrb[7].mxu1 }
 0x127   :  { %v823_v39 = vpop.f32.mrb[4].mxu0 }
 0x128   :  { %v824_v40 = vpop.f32.mrb[5].mxu0 }
 0x129   :  { %v825_v41 = vadd.f32 %v824_v40, %v823_v39  ;;  %v826_v42 = vpop.f32.mrb[6].mxu0 }
 0x12a   :  { %v827_v43 = vpop.f32.mrb[7].mxu0 }
 0x12b   :  { %v649_v44 = vadd.f32 %v825_v41, %v609_v34 }
 0x12d   :  { %v689_v45 = vadd.f32 %v688_v35, %v649_v44 }
 0x12f   :  { %694 = vst [vmem:[#allocation5] sm:$0xff] %v689_v45 }
 0x130   :  { %699 = vsyncadd [#allocation4], 96  ;;  %s961_s2 = smov [#allocation5]  }
 0x131   :  { %s700_s15 = sshll.u32 %s961_s2, 4  ;;  %s701_s15 = int_to_ptr.vmem [resolvable:$true] %s700_s15 }
 0x132   :  { %s929_s16 = scalar_lea.vmem %s701_s15, 32  ;;  %s933_s17 = scalar_lea.vmem %s701_s15, 128 }
 0x133   :  { %p930_p8 = scmp.ne.s32.totalorder %s701_s15, %s929_s16  ;;  %p934_p9 = scmp.lt.s32.totalorder %s701_s15, %s701_s15 }
 0x134   :  { %p935_p10 = scmp.lt.s32.totalorder %s933_s17, %s929_s16 }
 0x136   :  { %p936_p11 = por %p935_p10, %p934_p9 }
 0x138   :  { %p937_p12 = pnand %p936_p11, %p930_p8 }
 0x13a   :  { %940 = shalt.err (!%p937_p12)
}
 0x13b   :  { %s941_s20 = scalar_lea.hbm %s1048_s3, 32 }
 0x13c   :  { %p942_p13 = scmp.ne.s32.totalorder %s1048_s3, %s941_s20  ;;  %p945_p0 = scmp.lt.u32.totalorder %s941_s20, %s1048_s3 }
 0x13e   :  { %p947_p1 = pnand %p945_p0, %p942_p13 }
 0x140   :  { %950 = shalt.err (!%p947_p1)
}
 0x141   :  { %s962_s25 = smov 32   ;;  %s963_s1 = smov 2  }
 0x142   :  { %706 = dma.vmem_to_hbm [thread:$0]  %s701_s15, 32, %s1048_s3, [#allocation4], %s962_s25, %s962_s25, %s963_s1  }
 0x143   :  { %953 = dma.done.wait [#allocation4], 128  }
 0x144   :  { %954 = vsyncadd [#allocation4], 4294967168 }
 0x145   :  { %710 = vsyncpa [#allocation3], 1 }
 0x146   :  { %711 = vsyncpa [#allocation4], 1 }

</bundles_post_ra>
